<compile_context>
chip_gen: v7x
topology: tpu7x:2x2x1
jax: 0.10.0
libtpu: 0.0.40
codegen_flags: <defaults>
</compile_context>

<pallas_src>
import math
import functools

import jax
import jax.numpy as jnp
from jax import lax
from jax.experimental import pallas as pl
from jax.experimental.pallas import tpu as pltpu


# ---------------------------------------------------------------------------
# Fused kernel: whole forward pass, layers statically unrolled (no grid)
# ---------------------------------------------------------------------------
def _fused_forward_kernel(idx_ref, emb_ref, pos_ref,
                          wqkv_ref, wr_ref, w1_ref, w2_ref, bias_ref,
                          wo_ref, bo_ref,
                          out_ref, attn_ref,
                          *, num_classes):
    num_layers, d_model, three_di = wqkv_ref.shape
    d_internal = three_di // 3
    d_hidden = w1_ref.shape[2]
    seq = idx_ref.shape[0]
    vocab = emb_ref.shape[0]
    s_pad = attn_ref.shape[1]

    # ---- embedding gather (one-hot matmul, MXU friendly) + positional add ----
    idx = idx_ref[...]                                           # [S, 1] int32
    onehot = (lax.broadcasted_iota(jnp.int32, (seq, vocab), 1)
              == idx).astype(jnp.float32)                        # [S, V]
    x = (jnp.dot(onehot, emb_ref[...], preferred_element_type=jnp.float32)
         + pos_ref[...])                                         # [S, D]

    attn = None
    for l in range(num_layers):                                  # static unroll
        b_all = bias_ref[l]                                      # [4, maxw]
        bqkv = b_all[0:1, :three_di]
        br = b_all[1:2, :d_model]
        b1 = b_all[2:3, :d_hidden]
        b2 = b_all[3:4, :d_model]

        # fused QKV projection (scale folded into the Q third)
        qkv = (jnp.dot(x, wqkv_ref[l], preferred_element_type=jnp.float32)
               + bqkv)                                           # [S, 3*Di]
        q = qkv[:, :d_internal]
        k = qkv[:, d_internal:2 * d_internal]
        v = qkv[:, 2 * d_internal:]

        # scores[s_q, s_k] = sum_d q[s_q, d] * k[s_k, d]   (no materialized k.T)
        scores = lax.dot_general(q, k, (((1,), (1,)), ((), ())),
                                 preferred_element_type=jnp.float32)  # [S, S]

        # torch.nn.Softmax(dim=1) -> softmax over the key axis, exact division
        m = jnp.max(scores, axis=1, keepdims=True)
        e = jnp.exp(scores - m)
        attn = e / jnp.sum(e, axis=1, keepdims=True)

        o1 = jnp.dot(attn, v, preferred_element_type=jnp.float32)       # [S, Di]
        o_res1 = (jnp.dot(o1, wr_ref[l], preferred_element_type=jnp.float32)
                  + br + x)                                              # [S, D]

        # 2-layer ReLU FFN + residual
        h = jnp.maximum(
            jnp.dot(o_res1, w1_ref[l], preferred_element_type=jnp.float32)
            + b1, 0.0)
        x = (jnp.dot(h, w2_ref[l], preferred_element_type=jnp.float32)
             + b2 + o_res1)

    # ---- lane-dense attention writeback: pad [S,S] -> [S,s_pad] via an
    #      identity-pad matmul (exact; avoids masked partial stores) ----
    pad_eye = (lax.broadcasted_iota(jnp.int32, (seq, s_pad), 0) ==
               lax.broadcasted_iota(jnp.int32, (seq, s_pad), 1)).astype(jnp.float32)
    attn_ref[...] = jnp.dot(attn, pad_eye, preferred_element_type=jnp.float32)

    # ---- output head + exact log-softmax (padded class lanes masked out) ----
    logits = (jnp.dot(x, wo_ref[...], preferred_element_type=jnp.float32)
              + bo_ref[...])                                     # [S, c_pad]
    col = lax.broadcasted_iota(jnp.int32, logits.shape, 1)
    logits = jnp.where(col < num_classes, logits, -1e30)
    mm = jnp.max(logits, axis=-1, keepdims=True)
    lse = mm + jnp.log(jnp.sum(jnp.exp(logits - mm), axis=-1, keepdims=True))
    out_ref[...] = logits - lse


# ---------------------------------------------------------------------------
# Parameter prep: stack per-layer weights, fuse QKV, pack biases, pad head
# ---------------------------------------------------------------------------
def prepare_fused_params(params):
    d_internal = params["d_internal"]
    num_classes = params["num_classes"]
    scale = 1.0 / math.sqrt(d_internal)

    def stack(i):
        return jnp.stack([layer[i] for layer in params["layers"]], axis=0)

    # fold 1/sqrt(d_internal) into W_Q / b_Q (exact for power-of-two d_internal)
    wq, bq = stack(0) * scale, stack(1) * scale
    wk, bk = stack(2), stack(3)
    wv, bv = stack(4), stack(5)
    wqkv = jnp.concatenate([wq, wk, wv], axis=2)        # [L, D, 3*Di]
    bqkv = jnp.concatenate([bq, bk, bv], axis=2)        # [L, 1, 3*Di]
    br, b1, b2 = stack(7), stack(9), stack(11)

    d_model = wqkv.shape[1]
    d_hidden = stack(8).shape[2]
    maxw = max(3 * d_internal, d_model, d_hidden)

    def padw(a):  # [L, 1, w] -> [L, 1, maxw]
        return jnp.pad(a, ((0, 0), (0, 0), (0, maxw - a.shape[2])))

    bias = jnp.concatenate([padw(bqkv), padw(br), padw(b1), padw(b2)],
                           axis=1)                      # [L, 4, maxw]

    fused = {
        "embedding": params["embedding"],
        "pos_embedding": params["pos_embedding"],
        "num_classes": num_classes,
        "wqkv": wqkv,
        "wr": stack(6),
        "w1": stack(8),
        "w2": stack(10),
        "bias": bias,
    }

    # lane-dense output head: pad num_classes -> multiple of 128
    c_pad = ((num_classes + 127) // 128) * 128
    w_out = jnp.zeros((d_model, c_pad), jnp.float32).at[:, :num_classes].set(
        params["w_out"])
    b_out = jnp.zeros((1, c_pad), jnp.float32).at[:, :num_classes].set(
        params["b_out"])
    fused["w_out_pad"] = w_out
    fused["b_out_pad"] = b_out
    fused["c_pad"] = c_pad
    return fused


# ---------------------------------------------------------------------------
# Wrapper: one ungridded pallas_call, everything VMEM-resident
# ---------------------------------------------------------------------------
def transformer_forward(indices, fused):
    seq = indices.shape[0]
    emb = fused["embedding"]
    pos = fused["pos_embedding"][:seq]
    num_classes = fused["num_classes"]
    c_pad = fused["c_pad"]
    s_pad = ((seq + 127) // 128) * 128

    idx2d = indices.astype(jnp.int32).reshape(seq, 1)
    kernel = functools.partial(_fused_forward_kernel, num_classes=num_classes)

    vmem = pl.BlockSpec(memory_space=pltpu.MemorySpace.VMEM)
    n_in = 10

    out_pad, attn_pad = pl.pallas_call(
        kernel,
        out_shape=(jax.ShapeDtypeStruct((seq, c_pad), jnp.float32),
                   jax.ShapeDtypeStruct((seq, s_pad), jnp.float32)),
        in_specs=[vmem] * n_in,
        out_specs=(vmem, vmem),
    )(idx2d, emb, pos,
      fused["wqkv"], fused["wr"], fused["w1"], fused["w2"], fused["bias"],
      fused["w_out_pad"], fused["b_out_pad"])

    return out_pad[:, :num_classes], attn_pad[:, :seq]


# ---------------------------------------------------------------------------
# Deterministic parameter construction (reference layout, pre-transposed)
# ---------------------------------------------------------------------------
def make_params(key, vocab_size, num_positions, d_model, d_internal,
                num_classes, num_layers):
    def nrm(k, shape, scale=0.05):
        return scale * jax.random.normal(k, shape, dtype=jnp.float32)

    keys = jax.random.split(key, 2 + num_layers + 1)
    params = {
        "d_internal": d_internal,
        "num_classes": num_classes,
        "embedding": nrm(keys[0], (vocab_size, d_model)),
        "pos_embedding": nrm(keys[1], (num_positions, d_model)),
    }

    layers = []
    for i in range(num_layers):
        lk = jax.random.split(keys[2 + i], 12)
        layers.append((
            nrm(lk[0], (d_model, d_internal)),      # W_Q (pre-transposed)
            nrm(lk[1], (1, d_internal)),            # b_Q
            nrm(lk[2], (d_model, d_internal)),      # W_K
            nrm(lk[3], (1, d_internal)),            # b_K
            nrm(lk[4], (d_model, d_internal)),      # W_V
            nrm(lk[5], (1, d_internal)),            # b_V
            nrm(lk[6], (d_internal, d_model)),      # linear_reshape W
            nrm(lk[7], (1, d_model)),               # linear_reshape b
            nrm(lk[8], (d_model, 4 * d_model)),     # FFN layer 1 W
            nrm(lk[9], (1, 4 * d_model)),           # FFN layer 1 b
            nrm(lk[10], (4 * d_model, d_model)),    # FFN layer 2 W
            nrm(lk[11], (1, d_model)),              # FFN layer 2 b
        ))
    params["layers"] = layers

    ok = jax.random.split(keys[-1], 2)
    params["w_out"] = nrm(ok[0], (d_model, num_classes))
    params["b_out"] = nrm(ok[1], (1, num_classes))
    return params


# ---------------------------------------------------------------------------
# Pure-JAX reference (unfolded / unstacked params)
# ---------------------------------------------------------------------------
def reference_forward(indices, params):
    x = params["embedding"][indices] + params["pos_embedding"][: indices.shape[0]]
    attn = None
    for (wq, bq, wk, bk, wv, bv, wr, br, w1, b1, w2, b2) in params["layers"]:
        q = x @ wq + bq
        k = x @ wk + bk
        v = x @ wv + bv
        scores = (q @ k.T) / math.sqrt(params["d_internal"])
        attn = jax.nn.softmax(scores, axis=1)
        o_res1 = (attn @ v) @ wr + br + x
        h = jnp.maximum(o_res1 @ w1 + b1, 0.0)
        x = (h @ w2 + b2) + o_res1
    logits = x @ params["w_out"] + params["b_out"]
    return jax.nn.log_softmax(logits, axis=-1), attn


# ---------------------------------------------------------------------------
if __name__ == "__main__":
    vocab_size = 10
    num_positions = 20   # assignment spec: max seq len 20
    seq_len = 20
    d_model = 32
    d_internal = 16
    num_classes = 3
    num_layers = 2

    key = jax.random.PRNGKey(0)
    pkey, ikey = jax.random.split(key)

    params = make_params(pkey, vocab_size, num_positions, d_model,
                         d_internal, num_classes, num_layers)
    fused = prepare_fused_params(params)
    indices = jax.random.randint(ikey, (seq_len,), 0, vocab_size, dtype=jnp.int32)

    log_probs, attention = transformer_forward(indices, fused)
    jax.block_until_ready((log_probs, attention))

    assert log_probs.shape == (seq_len, num_classes)
    assert attention.shape == (seq_len, seq_len)

    ref_lp, ref_attn = reference_forward(indices, params)
    # exact softmax division in-kernel -> tight tolerance per the perf review
    assert jnp.allclose(log_probs, ref_lp, atol=1e-4, rtol=1e-4)
    assert jnp.allclose(attention, ref_attn, atol=1e-4, rtol=1e-4)

    print("KERNEL_OK")
</pallas_src>

<mosaic_0001>
module attributes {stable_mosaic.version = 11 : i64} {
  func.func @_fused_forward_kernel(%arg0: memref<20x1xi32, #tpu.memory_space<vmem>>, %arg1: memref<10x32xf32, #tpu.memory_space<vmem>>, %arg2: memref<20x32xf32, #tpu.memory_space<vmem>>, %arg3: memref<2x32x48xf32, #tpu.memory_space<vmem>>, %arg4: memref<2x16x32xf32, #tpu.memory_space<vmem>>, %arg5: memref<2x32x128xf32, #tpu.memory_space<vmem>>, %arg6: memref<2x128x32xf32, #tpu.memory_space<vmem>>, %arg7: memref<2x4x128xf32, #tpu.memory_space<vmem>>, %arg8: memref<32x128xf32, #tpu.memory_space<vmem>>, %arg9: memref<1x128xf32, #tpu.memory_space<vmem>>, %arg10: memref<20x128xf32, #tpu.memory_space<vmem>>, %arg11: memref<20x128xf32, #tpu.memory_space<vmem>>) attributes {dimension_semantics = [], scalar_prefetch = 0 : i64, scratch_operands = 0 : i64, tpu.core_type = #tpu.core_type<tc>} {
    %c0 = arith.constant 0 : index
    %c0_0 = arith.constant 0 : index
    %0 = vector.load %arg0[%c0, %c0_0] : memref<20x1xi32, #tpu.memory_space<vmem>>, vector<20x1xi32>
    %1 = tpu.iota {dimensions = array<i32: 1>} : vector<20x10xi32>
    %2 = vector.broadcast %0 : vector<20x1xi32> to vector<20x10xi32>
    %3 = arith.cmpi eq, %1, %2 : vector<20x10xi32>
    %4 = arith.extui %3 : vector<20x10xi1> to vector<20x10xi32>
    %5 = arith.sitofp %4 : vector<20x10xi32> to vector<20x10xf32>
    %c0_1 = arith.constant 0 : index
    %c0_2 = arith.constant 0 : index
    %6 = vector.load %arg1[%c0_1, %c0_2] : memref<10x32xf32, #tpu.memory_space<vmem>>, vector<10x32xf32>
    %cst = arith.constant dense<0.000000e+00> : vector<20x32xf32>
    %7 = tpu.matmul %5, %6, %cst {dimension_numbers = #tpu.dot_dimension_numbers<[1], [0], [0], [1], [0, 0, 1, 1], [], []>} : vector<20x10xf32>, vector<10x32xf32>, vector<20x32xf32> -> vector<20x32xf32>
    %c0_3 = arith.constant 0 : index
    %c0_4 = arith.constant 0 : index
    %8 = vector.load %arg2[%c0_3, %c0_4] : memref<20x32xf32, #tpu.memory_space<vmem>>, vector<20x32xf32>
    %9 = arith.addf %7, %8 : vector<20x32xf32>
    %c0_5 = arith.constant 0 : index
    %c0_6 = arith.constant 0 : index
    %c0_7 = arith.constant 0 : index
    %10 = vector.load %arg7[%c0_5, %c0_6, %c0_7] : memref<2x4x128xf32, #tpu.memory_space<vmem>>, vector<1x4x128xf32>
    %11 = vector.shape_cast %10 : vector<1x4x128xf32> to vector<4x128xf32>
    %12 = vector.extract_strided_slice %11 {offsets = [0, 0], sizes = [1, 48], strides = [1, 1]} : vector<4x128xf32> to vector<1x48xf32>
    %13 = vector.extract_strided_slice %11 {offsets = [1, 0], sizes = [1, 32], strides = [1, 1]} : vector<4x128xf32> to vector<1x32xf32>
    %14 = vector.extract_strided_slice %11 {offsets = [2, 0], sizes = [1, 128], strides = [1, 1]} : vector<4x128xf32> to vector<1x128xf32>
    %15 = vector.extract_strided_slice %11 {offsets = [3, 0], sizes = [1, 32], strides = [1, 1]} : vector<4x128xf32> to vector<1x32xf32>
    %c0_8 = arith.constant 0 : index
    %c0_9 = arith.constant 0 : index
    %c0_10 = arith.constant 0 : index
    %16 = vector.load %arg3[%c0_8, %c0_9, %c0_10] : memref<2x32x48xf32, #tpu.memory_space<vmem>>, vector<1x32x48xf32>
    %17 = vector.shape_cast %16 : vector<1x32x48xf32> to vector<32x48xf32>
    %cst_11 = arith.constant dense<0.000000e+00> : vector<20x48xf32>
    %18 = tpu.matmul %9, %17, %cst_11 {dimension_numbers = #tpu.dot_dimension_numbers<[1], [0], [0], [1], [0, 0, 1, 1], [], []>} : vector<20x32xf32>, vector<32x48xf32>, vector<20x48xf32> -> vector<20x48xf32>
    %19 = vector.broadcast %12 : vector<1x48xf32> to vector<20x48xf32>
    %20 = arith.addf %18, %19 : vector<20x48xf32>
    %21 = vector.extract_strided_slice %20 {offsets = [0, 0], sizes = [20, 16], strides = [1, 1]} : vector<20x48xf32> to vector<20x16xf32>
    %22 = vector.extract_strided_slice %20 {offsets = [0, 16], sizes = [20, 16], strides = [1, 1]} : vector<20x48xf32> to vector<20x16xf32>
    %23 = vector.extract_strided_slice %20 {offsets = [0, 32], sizes = [20, 16], strides = [1, 1]} : vector<20x48xf32> to vector<20x16xf32>
    %cst_12 = arith.constant dense<0.000000e+00> : vector<20x20xf32>
    %24 = tpu.matmul %21, %22, %cst_12 {dimension_numbers = #tpu.dot_dimension_numbers<[1], [1], [0], [0], [0, 0, 1, 0], [], []>} : vector<20x16xf32>, vector<20x16xf32>, vector<20x20xf32> -> vector<20x20xf32>
    %cst_13 = arith.constant dense<0xFF800000> : vector<20xf32>
    %25 = vector.multi_reduction <maximumf>, %24, %cst_13 [1] : vector<20x20xf32> to vector<20xf32>
    %26 = vector.shape_cast %25 : vector<20xf32> to vector<20x1xf32>
    %27 = vector.broadcast %26 : vector<20x1xf32> to vector<20x20xf32>
    %28 = arith.subf %24, %27 : vector<20x20xf32>
    %29 = math.exp %28 : vector<20x20xf32>
    %cst_14 = arith.constant dense<0.000000e+00> : vector<20xf32>
    %30 = vector.multi_reduction <add>, %29, %cst_14 [1] : vector<20x20xf32> to vector<20xf32>
    %31 = vector.shape_cast %30 : vector<20xf32> to vector<20x1xf32>
    %32 = vector.broadcast %31 : vector<20x1xf32> to vector<20x20xf32>
    %33 = arith.divf %29, %32 : vector<20x20xf32>
    %cst_15 = arith.constant dense<0.000000e+00> : vector<20x16xf32>
    %34 = tpu.matmul %33, %23, %cst_15 {dimension_numbers = #tpu.dot_dimension_numbers<[1], [0], [0], [1], [0, 0, 1, 1], [], []>} : vector<20x20xf32>, vector<20x16xf32>, vector<20x16xf32> -> vector<20x16xf32>
    %c0_16 = arith.constant 0 : index
    %c0_17 = arith.constant 0 : index
    %c0_18 = arith.constant 0 : index
    %35 = vector.load %arg4[%c0_16, %c0_17, %c0_18] : memref<2x16x32xf32, #tpu.memory_space<vmem>>, vector<1x16x32xf32>
    %36 = vector.shape_cast %35 : vector<1x16x32xf32> to vector<16x32xf32>
    %cst_19 = arith.constant dense<0.000000e+00> : vector<20x32xf32>
    %37 = tpu.matmul %34, %36, %cst_19 {dimension_numbers = #tpu.dot_dimension_numbers<[1], [0], [0], [1], [0, 0, 1, 1], [], []>} : vector<20x16xf32>, vector<16x32xf32>, vector<20x32xf32> -> vector<20x32xf32>
    %38 = vector.broadcast %13 : vector<1x32xf32> to vector<20x32xf32>
    %39 = arith.addf %37, %38 : vector<20x32xf32>
    %40 = arith.addf %39, %9 : vector<20x32xf32>
    %c0_20 = arith.constant 0 : index
    %c0_21 = arith.constant 0 : index
    %c0_22 = arith.constant 0 : index
    %41 = vector.load %arg5[%c0_20, %c0_21, %c0_22] : memref<2x32x128xf32, #tpu.memory_space<vmem>>, vector<1x32x128xf32>
    %42 = vector.shape_cast %41 : vector<1x32x128xf32> to vector<32x128xf32>
    %cst_23 = arith.constant dense<0.000000e+00> : vector<20x128xf32>
    %43 = tpu.matmul %40, %42, %cst_23 {dimension_numbers = #tpu.dot_dimension_numbers<[1], [0], [0], [1], [0, 0, 1, 1], [], []>} : vector<20x32xf32>, vector<32x128xf32>, vector<20x128xf32> -> vector<20x128xf32>
    %44 = vector.broadcast %14 : vector<1x128xf32> to vector<20x128xf32>
    %45 = arith.addf %43, %44 : vector<20x128xf32>
    %cst_24 = arith.constant 0.000000e+00 : f32
    %46 = vector.broadcast %cst_24 : f32 to vector<20x128xf32>
    %47 = arith.maximumf %45, %46 : vector<20x128xf32>
    %c0_25 = arith.constant 0 : index
    %c0_26 = arith.constant 0 : index
    %c0_27 = arith.constant 0 : index
    %48 = vector.load %arg6[%c0_25, %c0_26, %c0_27] : memref<2x128x32xf32, #tpu.memory_space<vmem>>, vector<1x128x32xf32>
    %49 = vector.shape_cast %48 : vector<1x128x32xf32> to vector<128x32xf32>
    %cst_28 = arith.constant dense<0.000000e+00> : vector<20x32xf32>
    %50 = tpu.matmul %47, %49, %cst_28 {dimension_numbers = #tpu.dot_dimension_numbers<[1], [0], [0], [1], [0, 0, 1, 1], [], []>} : vector<20x128xf32>, vector<128x32xf32>, vector<20x32xf32> -> vector<20x32xf32>
    %51 = vector.broadcast %15 : vector<1x32xf32> to vector<20x32xf32>
    %52 = arith.addf %50, %51 : vector<20x32xf32>
    %53 = arith.addf %52, %40 : vector<20x32xf32>
    %c1 = arith.constant 1 : index
    %c0_29 = arith.constant 0 : index
    %c0_30 = arith.constant 0 : index
    %54 = vector.load %arg7[%c1, %c0_29, %c0_30] : memref<2x4x128xf32, #tpu.memory_space<vmem>>, vector<1x4x128xf32>
    %55 = vector.shape_cast %54 : vector<1x4x128xf32> to vector<4x128xf32>
    %56 = vector.extract_strided_slice %55 {offsets = [0, 0], sizes = [1, 48], strides = [1, 1]} : vector<4x128xf32> to vector<1x48xf32>
    %57 = vector.extract_strided_slice %55 {offsets = [1, 0], sizes = [1, 32], strides = [1, 1]} : vector<4x128xf32> to vector<1x32xf32>
    %58 = vector.extract_strided_slice %55 {offsets = [2, 0], sizes = [1, 128], strides = [1, 1]} : vector<4x128xf32> to vector<1x128xf32>
    %59 = vector.extract_strided_slice %55 {offsets = [3, 0], sizes = [1, 32], strides = [1, 1]} : vector<4x128xf32> to vector<1x32xf32>
    %c1_31 = arith.constant 1 : index
    %c0_32 = arith.constant 0 : index
    %c0_33 = arith.constant 0 : index
    %60 = vector.load %arg3[%c1_31, %c0_32, %c0_33] : memref<2x32x48xf32, #tpu.memory_space<vmem>>, vector<1x32x48xf32>
    %61 = vector.shape_cast %60 : vector<1x32x48xf32> to vector<32x48xf32>
    %cst_34 = arith.constant dense<0.000000e+00> : vector<20x48xf32>
    %62 = tpu.matmul %53, %61, %cst_34 {dimension_numbers = #tpu.dot_dimension_numbers<[1], [0], [0], [1], [0, 0, 1, 1], [], []>} : vector<20x32xf32>, vector<32x48xf32>, vector<20x48xf32> -> vector<20x48xf32>
    %63 = vector.broadcast %56 : vector<1x48xf32> to vector<20x48xf32>
    %64 = arith.addf %62, %63 : vector<20x48xf32>
    %65 = vector.extract_strided_slice %64 {offsets = [0, 0], sizes = [20, 16], strides = [1, 1]} : vector<20x48xf32> to vector<20x16xf32>
    %66 = vector.extract_strided_slice %64 {offsets = [0, 16], sizes = [20, 16], strides = [1, 1]} : vector<20x48xf32> to vector<20x16xf32>
    %67 = vector.extract_strided_slice %64 {offsets = [0, 32], sizes = [20, 16], strides = [1, 1]} : vector<20x48xf32> to vector<20x16xf32>
    %cst_35 = arith.constant dense<0.000000e+00> : vector<20x20xf32>
    %68 = tpu.matmul %65, %66, %cst_35 {dimension_numbers = #tpu.dot_dimension_numbers<[1], [1], [0], [0], [0, 0, 1, 0], [], []>} : vector<20x16xf32>, vector<20x16xf32>, vector<20x20xf32> -> vector<20x20xf32>
    %cst_36 = arith.constant dense<0xFF800000> : vector<20xf32>
    %69 = vector.multi_reduction <maximumf>, %68, %cst_36 [1] : vector<20x20xf32> to vector<20xf32>
    %70 = vector.shape_cast %69 : vector<20xf32> to vector<20x1xf32>
    %71 = vector.broadcast %70 : vector<20x1xf32> to vector<20x20xf32>
    %72 = arith.subf %68, %71 : vector<20x20xf32>
    %73 = math.exp %72 : vector<20x20xf32>
    %cst_37 = arith.constant dense<0.000000e+00> : vector<20xf32>
    %74 = vector.multi_reduction <add>, %73, %cst_37 [1] : vector<20x20xf32> to vector<20xf32>
    %75 = vector.shape_cast %74 : vector<20xf32> to vector<20x1xf32>
    %76 = vector.broadcast %75 : vector<20x1xf32> to vector<20x20xf32>
    %77 = arith.divf %73, %76 : vector<20x20xf32>
    %cst_38 = arith.constant dense<0.000000e+00> : vector<20x16xf32>
    %78 = tpu.matmul %77, %67, %cst_38 {dimension_numbers = #tpu.dot_dimension_numbers<[1], [0], [0], [1], [0, 0, 1, 1], [], []>} : vector<20x20xf32>, vector<20x16xf32>, vector<20x16xf32> -> vector<20x16xf32>
    %c1_39 = arith.constant 1 : index
    %c0_40 = arith.constant 0 : index
    %c0_41 = arith.constant 0 : index
    %79 = vector.load %arg4[%c1_39, %c0_40, %c0_41] : memref<2x16x32xf32, #tpu.memory_space<vmem>>, vector<1x16x32xf32>
    %80 = vector.shape_cast %79 : vector<1x16x32xf32> to vector<16x32xf32>
    %cst_42 = arith.constant dense<0.000000e+00> : vector<20x32xf32>
    %81 = tpu.matmul %78, %80, %cst_42 {dimension_numbers = #tpu.dot_dimension_numbers<[1], [0], [0], [1], [0, 0, 1, 1], [], []>} : vector<20x16xf32>, vector<16x32xf32>, vector<20x32xf32> -> vector<20x32xf32>
    %82 = vector.broadcast %57 : vector<1x32xf32> to vector<20x32xf32>
    %83 = arith.addf %81, %82 : vector<20x32xf32>
    %84 = arith.addf %83, %53 : vector<20x32xf32>
    %c1_43 = arith.constant 1 : index
    %c0_44 = arith.constant 0 : index
    %c0_45 = arith.constant 0 : index
    %85 = vector.load %arg5[%c1_43, %c0_44, %c0_45] : memref<2x32x128xf32, #tpu.memory_space<vmem>>, vector<1x32x128xf32>
    %86 = vector.shape_cast %85 : vector<1x32x128xf32> to vector<32x128xf32>
    %cst_46 = arith.constant dense<0.000000e+00> : vector<20x128xf32>
    %87 = tpu.matmul %84, %86, %cst_46 {dimension_numbers = #tpu.dot_dimension_numbers<[1], [0], [0], [1], [0, 0, 1, 1], [], []>} : vector<20x32xf32>, vector<32x128xf32>, vector<20x128xf32> -> vector<20x128xf32>
    %88 = vector.broadcast %58 : vector<1x128xf32> to vector<20x128xf32>
    %89 = arith.addf %87, %88 : vector<20x128xf32>
    %cst_47 = arith.constant 0.000000e+00 : f32
    %90 = vector.broadcast %cst_47 : f32 to vector<20x128xf32>
    %91 = arith.maximumf %89, %90 : vector<20x128xf32>
    %c1_48 = arith.constant 1 : index
    %c0_49 = arith.constant 0 : index
    %c0_50 = arith.constant 0 : index
    %92 = vector.load %arg6[%c1_48, %c0_49, %c0_50] : memref<2x128x32xf32, #tpu.memory_space<vmem>>, vector<1x128x32xf32>
    %93 = vector.shape_cast %92 : vector<1x128x32xf32> to vector<128x32xf32>
    %cst_51 = arith.constant dense<0.000000e+00> : vector<20x32xf32>
    %94 = tpu.matmul %91, %93, %cst_51 {dimension_numbers = #tpu.dot_dimension_numbers<[1], [0], [0], [1], [0, 0, 1, 1], [], []>} : vector<20x128xf32>, vector<128x32xf32>, vector<20x32xf32> -> vector<20x32xf32>
    %95 = vector.broadcast %59 : vector<1x32xf32> to vector<20x32xf32>
    %96 = arith.addf %94, %95 : vector<20x32xf32>
    %97 = arith.addf %96, %84 : vector<20x32xf32>
    %98 = tpu.iota {dimensions = array<i32: 0>} : vector<20x128xi32>
    %99 = tpu.iota {dimensions = array<i32: 1>} : vector<20x128xi32>
    %100 = arith.cmpi eq, %98, %99 : vector<20x128xi32>
    %101 = arith.extui %100 : vector<20x128xi1> to vector<20x128xi32>
    %102 = arith.sitofp %101 : vector<20x128xi32> to vector<20x128xf32>
    %cst_52 = arith.constant dense<0.000000e+00> : vector<20x128xf32>
    %103 = tpu.matmul %77, %102, %cst_52 {dimension_numbers = #tpu.dot_dimension_numbers<[1], [0], [0], [1], [0, 0, 1, 1], [], []>} : vector<20x20xf32>, vector<20x128xf32>, vector<20x128xf32> -> vector<20x128xf32>
    %c0_53 = arith.constant 0 : index
    %c0_54 = arith.constant 0 : index
    %104 = vector.load %arg11[%c0_53, %c0_54] : memref<20x128xf32, #tpu.memory_space<vmem>>, vector<20x128xf32>
    tpu.vector_store %arg11[%c0_53, %c0_54], %103 {strides = array<i32>} : memref<20x128xf32, #tpu.memory_space<vmem>>, vector<20x128xf32>,
    %c0_55 = arith.constant 0 : index
    %c0_56 = arith.constant 0 : index
    %105 = vector.load %arg8[%c0_55, %c0_56] : memref<32x128xf32, #tpu.memory_space<vmem>>, vector<32x128xf32>
    %cst_57 = arith.constant dense<0.000000e+00> : vector<20x128xf32>
    %106 = tpu.matmul %97, %105, %cst_57 {dimension_numbers = #tpu.dot_dimension_numbers<[1], [0], [0], [1], [0, 0, 1, 1], [], []>} : vector<20x32xf32>, vector<32x128xf32>, vector<20x128xf32> -> vector<20x128xf32>
    %c0_58 = arith.constant 0 : index
    %c0_59 = arith.constant 0 : index
    %107 = vector.load %arg9[%c0_58, %c0_59] : memref<1x128xf32, #tpu.memory_space<vmem>>, vector<1x128xf32>
    %108 = vector.broadcast %107 : vector<1x128xf32> to vector<20x128xf32>
    %109 = arith.addf %106, %108 : vector<20x128xf32>
    %110 = tpu.iota {dimensions = array<i32: 1>} : vector<20x128xi32>
    %c3_i32 = arith.constant 3 : i32
    %111 = vector.broadcast %c3_i32 : i32 to vector<20x128xi32>
    %112 = arith.cmpi slt, %110, %111 : vector<20x128xi32>
    %cst_60 = arith.constant -1.000000e+30 : f32
    %113 = vector.broadcast %cst_60 : f32 to vector<20x128xf32>
    %114 = arith.select %112, %109, %113 : vector<20x128xi1>, vector<20x128xf32>
    %cst_61 = arith.constant dense<0xFF800000> : vector<20xf32>
    %115 = vector.multi_reduction <maximumf>, %114, %cst_61 [1] : vector<20x128xf32> to vector<20xf32>
    %116 = vector.shape_cast %115 : vector<20xf32> to vector<20x1xf32>
    %117 = vector.broadcast %116 : vector<20x1xf32> to vector<20x128xf32>
    %118 = arith.subf %114, %117 : vector<20x128xf32>
    %119 = math.exp %118 : vector<20x128xf32>
    %cst_62 = arith.constant dense<0.000000e+00> : vector<20xf32>
    %120 = vector.multi_reduction <add>, %119, %cst_62 [1] : vector<20x128xf32> to vector<20xf32>
    %121 = vector.shape_cast %120 : vector<20xf32> to vector<20x1xf32>
    %122 = math.log %121 : vector<20x1xf32>
    %123 = arith.addf %116, %122 : vector<20x1xf32>
    %124 = vector.broadcast %123 : vector<20x1xf32> to vector<20x128xf32>
    %125 = arith.subf %114, %124 : vector<20x128xf32>
    %c0_63 = arith.constant 0 : index
    %c0_64 = arith.constant 0 : index
    %126 = vector.load %arg10[%c0_63, %c0_64] : memref<20x128xf32, #tpu.memory_space<vmem>>, vector<20x128xf32>
    tpu.vector_store %arg10[%c0_63, %c0_64], %125 {strides = array<i32>} : memref<20x128xf32, #tpu.memory_space<vmem>>, vector<20x128xf32>,
    return
  }
}

</mosaic_0001>

<bundles_post_ra>
// kernel: tpu_custom_call.1
= control target key start
LH: loop header
LB: loop body
LE: loop exit
PB: predicated region body
PF: predicated region fallthrough
CT: control target
= control target key end

     0   :  { %17 = vsyncpa [#allocation3], 0  ;;  %v2415_v2 = vmov 0   ;;  %vm77_vm0 = vcmask 1041408   ;;  %vm2416_vm1 = vmmov 1   ;;  %v2417_v7 = vmov 0.0|0.0   ;;  %s3023_s0 = inlined_call_operand.vmem [shape: s32[20,1], index: 0, kind: input, shape index: {}]   ;;  %s3024_s1 = inlined_call_operand.vmem [shape: f32[10,32], index: 1, kind: input, shape index: {}]   ;;  %s3025_s2 = inlined_call_operand.vmem [shape: f32[20,32], index: 2, kind: input, shape index: {}]   ;;  %s3026_s3 = inlined_call_operand.vmem [shape: f32[2,32,48], index: 3, kind: input, shape index: {}]   ;;  %s3027_s4 = inlined_call_operand.vmem [shape: f32[2,16,32], index: 4, kind: input, shape index: {}]   ;;  %s3028_s5 = inlined_call_operand.vmem [shape: f32[2,32,128], index: 5, kind: input, shape index: {}]   ;;  %s3029_s6 = inlined_call_operand.vmem [shape: f32[2,128,32], index: 6, kind: input, shape index: {}]   ;;  %s3030_s7 = inlined_call_operand.vmem [shape: f32[2,4,128], index: 7, kind: input, shape index: {}]   ;;  %s3031_s8 = inlined_call_operand.vmem [shape: f32[32,128], index: 8, kind: input, shape index: {}]   ;;  %s3032_s9 = inlined_call_operand.vmem [shape: f32[1,128], index: 9, kind: input, shape index: {}]   ;;  %s3033_s10 = inlined_call_operand.hbm [shape: f32[20,128], index: 10, kind: output, shape index: {0}]   ;;  %s3034_s11 = inlined_call_operand.hbm [shape: f32[20,128], index: 11, kind: output, shape index: {1}]  }
   0x1   :  { %v39_v0 = vld [vmem:[%s3023_s0] sm:$0xff]  ;;  %v41_v1 = vld [vmem:[%s3023_s0 + $0x10] sm:$0xf]  ;;  %2309 = vset.pattern.permute.xlu0 %v2415_v2  ;;  %2310 = vset.pattern.permute.xlu1 %v2415_v2  ;;  %v63_v4 = vld [vmem:[%s3024_s1 + $0x8] sm:$0x3]  ;;  %vm2418_vm3 = vmmov 0  }
   0x2   :  { %v62_v3 = vld [vmem:[%s3024_s1] sm:$0xff]  ;;  %45 = vperm.xlu0 %2309, %v39_v0   ;;  %51 = vperm.xlu1 %2310, %v41_v1   ;;  %vm2194_vm2 = vmpackc.low %vm77_vm0, %vm2416_vm1  ;;  %v40_v6 = vld [vmem:[%s3023_s0 + $0x8] sm:$0xff]  ;;  %v2419_v8 = vmov 0.0  }
   0x3   :  { %v2193_v5 = vpack.c.bf16 %v63_v4, %v62_v3  ;;  %2192 = vmatprep.subr.bf16.mxu0 %v2417_v7  ;;  %1915 = vmatprep.mubr.msk.f32.mxu0 %vm2418_vm3, %v2419_v8 }
   0x4   :  { %18 = vsyncpa [#allocation5], 0  ;;  %2196 = vmatprep.subr.bf16.mxu1 %v2417_v7  ;;  %1932 = vmatprep.mubr.msk.f32.mxu1 %vm2418_vm3, %v2419_v8  ;;  %v162_v9 = vld [vmem:[%s3026_s3] sm:$0xff]  ;;  %v163_v10 = vld [vmem:[%s3026_s3 + $0x8] sm:$0xff]  ;;  %v42_v12 = vlaneseq  ;;  %vm67_vm4 = vcmask 80896   ;;  %vm170_vm8 = vcmask 261120  }
   0x5   :  { %2195 = vmatpush3.bf16.msk.msra.mxu0 %vm2194_vm2, %v2193_v5  ;;  %v2197_v11 = vpack.c.bf16 %v163_v10, %v162_v9  ;;  %v164_v20 = vld [vmem:[%s3026_s3 + $0x10] sm:$0xff]  ;;  %v165_v21 = vld [vmem:[%s3026_s3 + $0x18] sm:$0xff]  ;;  %v64_v23 = vld [vmem:[%s3025_s2] sm:$0xff]  ;;  %s2420_s21 = smov 112   ;;  %vm269_vm9 = vcmask 130048   ;;  %vm362_vm11 = vcmask 162816  }
   0x6   :  { %2202 = vmatprep.subr.bf16.mxu0 %v2417_v7  ;;  %48 = vperm.xlu0 %2309, %v40_v6   ;;  %v2516_v13 = vand.u32 127, %v42_v12  ;;  %v2200_v22 = vpack.c.bf16 %v165_v21, %v164_v20  ;;  %v65_v27 = vld [vmem:[%s3025_s2 + $0x8] sm:$0xff]  ;;  %v66_v31 = vld [vmem:[%s3025_s2 + $0x10] sm:$0xf]  ;;  %v2564_v35 = vshrl.u32 %v42_v12, 7  ;;  %vm2579_vm10 = vmpackc.low %vm269_vm9, %vm269_vm9  ;;  %vm369_vm12 = vcmask 158720  }
   0x7   :  { %2198 = vmatpush3.bf16.msra.mxu1 %v2197_v11  ;;  %v2570_v37 = vld [vmem:[%s3030_s7] sm:$0xf]  ;;  %s2421_s22 = smov 96   ;;  %vm414_vm13 = vcmask 1043456  }
   0x8   :  { %2199 = vmatprep.subr.bf16.mxu1 %v2417_v7  ;;  %v168_v36 = vsub.s32 0, %v2564_v35  ;;  %vm1439_vm14 = vcmp.eq.s32.totalorder %v2564_v35, %v2516_v13  ;;  %vm1634_vm2 = vcmp.lt.s32.totalorder %v2516_v13, 3 }
   0xa   :  { %v169_v39 = vrot.slane %v2570_v37, %v168_v36 }
   0xb   :  { %2201 = vmatpush3.bf16.msra.mxu1 %v2200_v22 }
   0xc   :  { %2206 = vmatprep.subr.bf16.mxu1 %v2417_v7 }
  0x81   :  { %v46_v14 = vpop.permute.xlu0 %45  ;;  %v52_v16 = vpop.permute.xlu1 %51 }
  0x82   :  { %vm53_vm5 = vcmp.eq.s32.totalorder %v2516_v13, %v46_v14  ;;  %vm55_vm7 = vcmp.eq.s32.totalorder %v2516_v13, %v52_v16 }
  0x83   :  { %v1708_v15 = vsel %vm53_vm5, 1.0, %v2419_v8  ;;  %v1710_v19 = vsel %vm55_vm7, 1.0, %v2419_v8 }
  0x84   :  { %1916 = vmatmul.mubr.msk.f32.vlgmr.msra.gmra.mrb[0].mxu0 %vm67_vm4, %v1708_v15 }
  0x85   :  { %v49_v17 = vpop.permute.xlu0 %48  ;;  %1918 = vmatprep.mubr.msk.f32.mxu0 %vm2418_vm3, %v2419_v8 }
  0x86   :  { %vm54_vm6 = vcmp.eq.s32.totalorder %v2516_v13, %v49_v17 }
  0x87   :  { %v1709_v18 = vsel %vm54_vm6, 1.0, %v2419_v8 }
  0x88   :  { %1919 = vmatmul.mubr.msk.f32.gmra.mrb[2].mxu0 %vm67_vm4, %v1709_v18  ;;  %v497_v18 = vld [vmem:[%s3027_s4] sm:$0xff] }
  0x89   :  { %1921 = vmatprep.mubr.msk.f32.mxu0 %vm2418_vm3, %v2419_v8 }
  0x8c   :  { %1922 = vmatmul.mubr.msk.f32.gmra.mrb[4].mxu0 %vm67_vm4, %v1710_v19  ;;  %v498_v19 = vld [vmem:[%s3027_s4 + $0x8] sm:$0xff] }
  0x8d   :  { %1947 = vmatprep.mubr.msk.f32.mxu0 %vm2418_vm3, %v2419_v8  ;;  %v2210_v20 = vpack.c.bf16 %v498_v19, %v497_v18 }
 0x157   :  { %v147_v24 = vpop.f32.mrb[0].mxu0 }
 0x158   :  { %v2540_v25 = vadd.f32 %v147_v24, %v64_v23  ;;  %v1917_v26 = vpop.f32.mrb[1].mxu0 }
 0x15a   :  { %1933 = vmatmul.mubr.msk.f32.vlgmr.msra.gmra.mrb[0].mxu1 %vm170_vm8, %v2540_v25 }
 0x15b   :  { %v152_v28 = vpop.f32.mrb[2].mxu0  ;;  %1935 = vmatprep.mubr.msk.f32.mxu1 %vm2418_vm3, %v2419_v8 }
 0x15c   :  { %v2549_v29 = vadd.f32 %v152_v28, %v65_v27  ;;  %v1920_v30 = vpop.f32.mrb[3].mxu0 }
 0x15e   :  { %1936 = vmatmul.mubr.msk.f32.gmra.mrb[2].mxu1 %vm170_vm8, %v2549_v29 }
 0x15f   :  { %v157_v32 = vpop.f32.mrb[4].mxu0  ;;  %1938 = vmatprep.mubr.msk.f32.mxu1 %vm2418_vm3, %v2419_v8 }
 0x160   :  { %v2558_v33 = vadd.f32 %v157_v32, %v66_v31  ;;  %v1923_v34 = vpop.f32.mrb[5].mxu0 }
 0x162   :  { %1939 = vmatmul.mubr.msk.f32.gmra.mrb[4].mxu1 %vm170_vm8, %v2558_v33 }
 0x163   :  { %1962 = vmatprep.mubr.msk.f32.mxu1 %vm2418_vm3, %v2419_v8 }
 0x22d   :  { %v246_v38 = vpop.f32.mrb[0].mxu1 }
 0x22e   :  { %v1934_v40 = vpop.f32.mrb[1].mxu1  ;;  %v247_v42 = vadd.f32 %v246_v38, %v169_v39 }
 0x231   :  { %v251_v41 = vpop.f32.mrb[2].mxu1 }
 0x232   :  { %v252_v43 = vadd.f32 %v251_v41, %v169_v39  ;;  %v1937_v44 = vpop.f32.mrb[3].mxu1  ;;  %v595_v41 = vld [vmem:[%s3028_s5] sm:$0xff] }
 0x234   :  { %v2311_v45 = vpack.i.bf16 %v252_v43, %v247_v42 }
 0x235   :  { %v256_v46 = vpop.f32.mrb[4].mxu1 }
 0x236   :  { %2312 = vrot.lane.b32.xlu1 %v2311_v45, %s2420_s21  ;;  %v257_v47 = vadd.f32 %v256_v46, %v169_v39  ;;  %v1940_v48 = vpop.f32.mrb[5].mxu1 }
 0x238   :  { %267 = vrot.lane.b32.xlu0 %v257_v47, %s2420_s21 }
 0x2a8   :  { %v2313_v49 = vpop.permute.xlu1 %2312 }
 0x2a9   :  { %v2315_v50 = vunpack.i.h.bf16 %v2313_v49  ;;  %v2314_v51 = vunpack.i.l.bf16 %v2313_v49 }
 0x2aa   :  { %v268_v54 = vpop.permute.xlu0 %267 }
 0x2ab   :  { %v2203_v53 = vpack.c.bf16 %v2315_v50, %v2314_v51  ;;  %v597_v50 = vld [vmem:[%s3028_s5 + $0x10] sm:$0xff]  ;;  %v598_v51 = vld [vmem:[%s3028_s5 + $0x18] sm:$0xff] }
 0x2ad   :  { %2205 = vmatpush3.bf16.xpose.msk.msra.mxu0 %vm2579_vm10, %v2203_v53  ;;  %v2216_v53 = vpack.c.bf16 %v598_v51, %v597_v50  ;;  %v1737_v51 = vld [vmem:[%s3026_s3 + $0x30] sm:$0xff] }
 0x2ae   :  { %1945 = vmatprep.subr.mxu0 %v2419_v8 }
 0x2b5   :  { %1946 = vmatpush3.xpose.msk.msra.mxu0 %vm269_vm9, %v268_v54  ;;  %v695_v54 = vld [vmem:[%s3029_s6] sm:$0xff] }
 0x2b6   :  { %2209 = vmatprep.subr.bf16.mxu0 %v2417_v7 }
 0x2b8   :  { %1948 = vmatmul.mubr.msk.f32.vlgmr.msra.gmra.mrb[6].mxu0 %vm269_vm9, %v247_v42  ;;  %v596_v42 = vld [vmem:[%s3028_s5 + $0x8] sm:$0xff] }
 0x2b9   :  { %1950 = vmatprep.mubr.msk.f32.mxu0 %vm2418_vm3, %v2419_v8  ;;  %2211 = vmatpush3.bf16.msra.mxu0 %v2210_v20 }
 0x2ba   :  { %2218 = vmatprep.subr.bf16.mxu0 %v2417_v7 }
 0x2bc   :  { %1951 = vmatmul.mubr.msk.f32.gmra.mrb[8].mxu0 %vm269_vm9, %v252_v43  ;;  %v2213_v43 = vpack.c.bf16 %v596_v42, %v595_v41 }
 0x2bd   :  { %1953 = vmatprep.mubr.msk.f32.mxu0 %vm2418_vm3, %v2419_v8 }
 0x2c0   :  { %1954 = vmatmul.mubr.msk.f32.gmra.mrb[10].mxu0 %vm269_vm9, %v257_v47 }
 0x2c1   :  { %1975 = vmatprep.mubr.msk.f32.mxu0 %vm2418_vm3, %v2419_v8 }
 0x38b   :  { %v348_v55 = vpop.f32.mrb[6].mxu0 }
 0x38c   :  { %v1949_v56 = vpop.f32.mrb[7].mxu0  ;;  %v363_v57 = vsel %vm362_vm11, %v348_v55, -inf }
 0x38d   :  { %364 = vmax.xlane.f32.xlu1 %v363_v57  ;;  %v697_v56 = vld [vmem:[%s3029_s6 + $0x10] sm:$0xff] }
 0x38f   :  { %v353_v58 = vpop.f32.mrb[8].mxu0 }
 0x390   :  { %v1952_v59 = vpop.f32.mrb[9].mxu0  ;;  %v366_v60 = vsel %vm362_vm11, %v353_v58, -inf }
 0x391   :  { %367 = vmax.xlane.f32.xlu0 %v366_v60  ;;  %v699_v60 = vld [vmem:[%s3029_s6 + $0x20] sm:$0xff] }
 0x393   :  { %v358_v61 = vpop.f32.mrb[10].mxu0 }
 0x394   :  { %v1955_v62 = vpop.f32.mrb[11].mxu0  ;;  %v370_v63 = vsel %vm369_vm12, %v358_v61, -inf }
 0x395   :  { %371 = vmax.xlane.f32.xlu0 %v370_v63  ;;  %v701_v63 = vld [vmem:[%s3029_s6 + $0x30] sm:$0xff] }
 0x41a   :  { %v365_v0 = vpop.xlane.xlu1 %364 }
 0x41b   :  { %v373_v1 = vsub.f32 %v348_v55, %v365_v0  ;;  %v696_v55 = vld [vmem:[%s3029_s6 + $0x8] sm:$0xff]  ;;  %v702_v0 = vld [vmem:[%s3029_s6 + $0x38] sm:$0xff] }
 0x41c   :  { %v2219_v57 = vpack.c.bf16 %v696_v55, %v695_v54  ;;  %v713_v55 = vsub.s32 3, %v2564_v35 }
 0x41d   :  { %v376_v2 = vmul.f32 1.442695, %v373_v1  ;;  %v2228_v1 = vpack.c.bf16 %v702_v0, %v701_v63 }
 0x41e   :  { %v368_v3 = vpop.xlane.xlu0 %367 }
 0x41f   :  { %2331 = vpow2.f32 %v376_v2  ;;  %v374_v4 = vsub.f32 %v353_v58, %v368_v3  ;;  %v698_v58 = vld [vmem:[%s3029_s6 + $0x18] sm:$0xff]  ;;  %v703_v2 = vld [vmem:[%s3029_s6 + $0x40] sm:$0xff]  ;;  %v704_v3 = vld [vmem:[%s3029_s6 + $0x48] sm:$0xff] }
 0x420   :  { %v2222_v59 = vpack.c.bf16 %v698_v58, %v697_v56  ;;  %v714_v56 = vrot.slane %v2570_v37, %v713_v55 }
 0x421   :  { %v378_v5 = vmul.f32 1.442695, %v374_v4  ;;  %v2231_v4 = vpack.c.bf16 %v704_v3, %v703_v2 }
 0x422   :  { %v372_v6 = vpop.xlane.xlu0 %371 }
 0x423   :  { %2333 = vpow2.f32 %v378_v5  ;;  %v375_v9 = vsub.f32 %v358_v61, %v372_v6  ;;  %v700_v61 = vld [vmem:[%s3029_s6 + $0x28] sm:$0xff]  ;;  %v705_v5 = vld [vmem:[%s3029_s6 + $0x50] sm:$0xff]  ;;  %v706_v6 = vld [vmem:[%s3029_s6 + $0x58] sm:$0xff] }
 0x424   :  { %v2225_v62 = vpack.c.bf16 %v700_v61, %v699_v60 }
 0x425   :  { %v380_v10 = vmul.f32 1.442695, %v375_v9  ;;  %v2234_v9 = vpack.c.bf16 %v706_v6, %v705_v5 }
 0x427   :  { %2335 = vpow2.f32 %v380_v10  ;;  %v707_v10 = vld [vmem:[%s3029_s6 + $0x60] sm:$0xff] }
 0x429   :  { %v2332_v11 = vpop.eup %2331 }
 0x42a   :  { %v382_v12 = vsel %vm362_vm11, %v2332_v11, 0.0 }
 0x42b   :  { %383 = vadd.xlane.f32.xlu1 %v382_v12 }
 0x42d   :  { %v2334_v14 = vpop.eup %2333 }
 0x42e   :  { %v385_v15 = vsel %vm362_vm11, %v2334_v14, 0.0 }
 0x42f   :  { %386 = vadd.xlane.f32.xlu0 %v385_v15 }
 0x431   :  { %v2336_v16 = vpop.eup %2335 }
 0x432   :  { %v388_v17 = vsel %vm369_vm12, %v2336_v16, 0.0 }
 0x433   :  { %389 = vadd.xlane.f32.xlu1 %v388_v17 }
 0x444   :  { %401 = vrot.lane.b32.xlu1 %v257_v47, %s2421_s22 }
 0x445   :  { %2317 = vrot.lane.b32.xlu0 %v2311_v45, %s2421_s22 }
 0x4b8   :  { %v384_v21 = vpop.xlane.xlu1 %383 }
 0x4b9   :  { %2337 = vrcp.f32 %v384_v21 }
 0x4bc   :  { %v387_v22 = vpop.xlane.xlu0 %386 }
 0x4bd   :  { %2339 = vrcp.f32 %v387_v22 }
 0x4c0   :  { %v390_v23 = vpop.xlane.xlu1 %389  ;;  %v2318_v24 = vpop.permute.xlu0 %2317 }
 0x4c1   :  { %v2320_v26 = vunpack.i.h.bf16 %v2318_v24  ;;  %v2319_v27 = vunpack.i.l.bf16 %v2318_v24  ;;  %2341 = vrcp.f32 %v390_v23 }
 0x4c3   :  { %v2207_v28 = vpack.c.bf16 %v2320_v26, %v2319_v27  ;;  %v2338_v30 = vpop.eup %2337 }
 0x4c4   :  { %v392_v31 = vmul.f32 %v2338_v30, %v2332_v11  ;;  %v402_v32 = vpop.permute.xlu1 %401  ;;  %v708_v11 = vld [vmem:[%s3029_s6 + $0x68] sm:$0xff] }
 0x4c5   :  { %2208 = vmatpush3.bf16.msra.mxu1 %v2207_v28  ;;  %v2237_v12 = vpack.c.bf16 %v708_v11, %v707_v10  ;;  %v709_v28 = vld [vmem:[%s3029_s6 + $0x70] sm:$0xff] }
 0x4c6   :  { %1960 = vmatprep.subr.mxu1 %v2419_v8 }
 0x4c7   :  { %v2340_v34 = vpop.eup %2339 }
 0x4c8   :  { %v394_v38 = vmul.f32 %v2340_v34, %v2334_v14  ;;  %v501_v14 = vsub.s32 1, %v2564_v35  ;;  %v601_v34 = vsub.s32 2, %v2564_v35 }
 0x4c9   :  { %1961 = vmatpush3.msk.msra.mxu1 %vm414_vm13, %v402_v32 }
 0x4ca   :  { %1963 = vmatmul.mubr.msk.f32.vlgmr.msra.gmra.mrb[6].mxu1 %vm362_vm11, %v392_v31  ;;  %2212 = vmatprep.subr.bf16.mxu1 %v2417_v7  ;;  %v502_v15 = vrot.slane %v2570_v37, %v501_v14  ;;  %v1736_v31 = vld [vmem:[%s3026_s3 + $0x28] sm:$0xff] }
 0x4cb   :  { %1965 = vmatprep.mubr.msk.f32.mxu1 %vm2418_vm3, %v2419_v8  ;;  %v2342_v39 = vpop.eup %2341  ;;  %2214 = vmatpush3.bf16.msra.mxu1 %v2213_v43 }
 0x4cc   :  { %v396_v40 = vmul.f32 %v2342_v39, %v2336_v16  ;;  %2215 = vmatprep.subr.bf16.mxu1 %v2417_v7 }
 0x4ce   :  { %1966 = vmatmul.mubr.msk.f32.gmra.mrb[8].mxu1 %vm362_vm11, %v394_v38  ;;  %v602_v38 = vrot.slane %v2570_v37, %v601_v34 }
 0x4cf   :  { %1968 = vmatprep.mubr.msk.f32.mxu1 %vm2418_vm3, %v2419_v8  ;;  %2217 = vmatpush3.bf16.msra.mxu1 %v2216_v53  ;;  %v1738_v53 = vld [vmem:[%s3026_s3 + $0x38] sm:$0xff] }
 0x4d0   :  { %2242 = vmatprep.subr.bf16.mxu1 %v2417_v7  ;;  %v2246_v54 = vpack.c.bf16 %v1738_v53, %v1737_v51  ;;  %v1752_v51 = vld [vmem:[%s3027_s4 + $0x10] sm:$0xff]  ;;  %v1753_v53 = vld [vmem:[%s3027_s4 + $0x18] sm:$0xff] }
 0x4d2   :  { %1969 = vmatmul.mubr.msk.f32.gmra.mrb[10].mxu1 %vm362_vm11, %v396_v40 }
 0x4d3   :  { %1992 = vmatprep.mubr.msk.f32.mxu1 %vm2418_vm3, %v2419_v8 }
 0x59d   :  { %v483_v44 = vpop.f32.mrb[6].mxu1 }
 0x59e   :  { %v1964_v45 = vpop.f32.mrb[7].mxu1  ;;  %1976 = vmatmul.mubr.msk.f32.vlgmr.msra.gmra.mrb[12].mxu0 %vm269_vm9, %v483_v44 }
 0x59f   :  { %1978 = vmatprep.mubr.msk.f32.mxu0 %vm2418_vm3, %v2419_v8  ;;  %2220 = vmatpush3.bf16.msra.mxu0 %v2219_v57 }
 0x5a0   :  { %2221 = vmatprep.subr.bf16.mxu0 %v2417_v7 }
 0x5a1   :  { %v488_v46 = vpop.f32.mrb[8].mxu1 }
 0x5a2   :  { %v1967_v47 = vpop.f32.mrb[9].mxu1  ;;  %1979 = vmatmul.mubr.msk.f32.gmra.mrb[14].mxu0 %vm269_vm9, %v488_v46 }
 0x5a3   :  { %1981 = vmatprep.mubr.msk.f32.mxu0 %vm2418_vm3, %v2419_v8  ;;  %2223 = vmatpush3.bf16.msra.mxu0 %v2222_v59 }
 0x5a4   :  { %2224 = vmatprep.subr.bf16.mxu0 %v2417_v7 }
 0x5a5   :  { %v493_v48 = vpop.f32.mrb[10].mxu1 }
 0x5a6   :  { %v1970_v49 = vpop.f32.mrb[11].mxu1  ;;  %1982 = vmatmul.mubr.msk.f32.gmra.mrb[16].mxu0 %vm269_vm9, %v493_v48 }
 0x5a7   :  { %2033 = vmatprep.mubr.msk.f32.mxu0 %vm2418_vm3, %v2419_v8  ;;  %2226 = vmatpush3.bf16.msra.mxu0 %v2225_v62 }
 0x5a8   :  { %2227 = vmatprep.subr.bf16.mxu0 %v2417_v7 }
 0x5ab   :  { %2229 = vmatpush3.bf16.msra.mxu0 %v2228_v1 }
 0x5ac   :  { %2230 = vmatprep.subr.bf16.mxu0 %v2417_v7 }
 0x5af   :  { %2232 = vmatpush3.bf16.msra.mxu0 %v2231_v4  ;;  %v2768_v4 = vld [vmem:[%s3030_s7 + $0x4] sm:$0xf] }
 0x5b0   :  { %2233 = vmatprep.subr.bf16.mxu0 %v2417_v7  ;;  %v808_v6 = vrot.slane %v2768_v4, %v168_v36 }
 0x5b3   :  { %2235 = vmatpush3.bf16.msra.mxu0 %v2234_v9 }
 0x5b4   :  { %2236 = vmatprep.subr.bf16.mxu0 %v2417_v7 }
 0x5b7   :  { %2238 = vmatpush3.bf16.msra.mxu0 %v2237_v12 }
 0x5b8   :  { %2239 = vmatprep.subr.bf16.mxu0 %v2417_v7 }
 0x671   :  { %v578_v16 = vpop.f32.mrb[12].mxu0 }
 0x672   :  { %v579_v17 = vadd.f32 %v578_v16, %v502_v15  ;;  %v1977_v18 = vpop.f32.mrb[13].mxu0 }
 0x674   :  { %v592_v19 = vadd.f32 %v579_v17, %v2540_v25 }
 0x675   :  { %v583_v20 = vpop.f32.mrb[14].mxu0 }
 0x676   :  { %v584_v21 = vadd.f32 %v583_v20, %v502_v15  ;;  %v1980_v22 = vpop.f32.mrb[15].mxu0  ;;  %1993 = vmatmul.mubr.msk.f32.vlgmr.msra.gmra.mrb[12].mxu1 %vm170_vm8, %v592_v19 }
 0x677   :  { %1995 = vmatprep.mubr.msk.f32.mxu1 %vm2418_vm3, %v2419_v8 }
 0x678   :  { %v593_v23 = vadd.f32 %v584_v21, %v2549_v29  ;;  %v710_v29 = vld [vmem:[%s3029_s6 + $0x78] sm:$0xff] }
 0x679   :  { %v588_v24 = vpop.f32.mrb[16].mxu0  ;;  %v2240_v30 = vpack.c.bf16 %v710_v29, %v709_v28 }
 0x67a   :  { %v589_v26 = vadd.f32 %v588_v24, %v502_v15  ;;  %v1983_v27 = vpop.f32.mrb[17].mxu0  ;;  %1996 = vmatmul.mubr.msk.f32.gmra.mrb[14].mxu1 %vm170_vm8, %v593_v23 }
 0x67b   :  { %1998 = vmatprep.mubr.msk.f32.mxu1 %vm2418_vm3, %v2419_v8  ;;  %2241 = vmatpush3.bf16.msra.mxu0 %v2240_v30 }
 0x67c   :  { %v594_v25 = vadd.f32 %v589_v26, %v2558_v33  ;;  %2255 = vmatprep.subr.bf16.mxu0 %v2417_v7  ;;  %v1735_v33 = vld [vmem:[%s3026_s3 + $0x20] sm:$0xff] }
 0x67d   :  { %v2243_v32 = vpack.c.bf16 %v1736_v31, %v1735_v33 }
 0x67e   :  { %1999 = vmatmul.mubr.msk.f32.gmra.mrb[16].mxu1 %vm170_vm8, %v594_v25 }
 0x67f   :  { %2050 = vmatprep.mubr.msk.f32.mxu1 %vm2418_vm3, %v2419_v8  ;;  %2244 = vmatpush3.bf16.msra.mxu1 %v2243_v32 }
 0x680   :  { %2245 = vmatprep.subr.bf16.mxu1 %v2417_v7 }
 0x683   :  { %2247 = vmatpush3.bf16.msra.mxu1 %v2246_v54  ;;  %v2256_v54 = vpack.c.bf16 %v1753_v53, %v1752_v51  ;;  %v1438_v51 = vadd.s32 16, %v2564_v35 }
 0x684   :  { %2248 = vmatprep.subr.bf16.mxu1 %v2417_v7 }
 0x685   :  { %vm1441_vm1 = vcmp.eq.s32.totalorder %v1438_v51, %v2516_v13 }
 0x749   :  { %v678_v39 = vpop.f32.mrb[12].mxu1 }
 0x74a   :  { %v679_v40 = vadd.f32 %v678_v39, %v602_v38  ;;  %v1994_v41 = vpop.f32.mrb[13].mxu1 }
 0x74c   :  { %v692_v42 = vmax.f32 %v679_v40, 0.0 }
 0x74d   :  { %v683_v43 = vpop.f32.mrb[14].mxu1 }
 0x74e   :  { %v684_v44 = vadd.f32 %v683_v43, %v602_v38  ;;  %v1997_v45 = vpop.f32.mrb[15].mxu1  ;;  %2034 = vmatmul.mubr.f32.vlgmr.msra.gmra.mrb[18].mxu0 %v692_v42 }
 0x74f   :  { %2036 = vmatprep.mubr.msk.f32.mxu0 %vm2418_vm3, %v2419_v8  ;;  %2257 = vmatpush3.bf16.msra.mxu0 %v2256_v54 }
 0x750   :  { %v693_v46 = vmax.f32 %v684_v44, 0.0  ;;  %2264 = vmatprep.subr.bf16.mxu0 %v2417_v7 }
 0x751   :  { %v688_v47 = vpop.f32.mrb[16].mxu1 }
 0x752   :  { %v689_v48 = vadd.f32 %v688_v47, %v602_v38  ;;  %v2000_v49 = vpop.f32.mrb[17].mxu1  ;;  %2037 = vmatmul.mubr.f32.gmra.mrb[20].mxu0 %v693_v46 }
 0x753   :  { %2039 = vmatprep.mubr.msk.f32.mxu0 %vm2418_vm3, %v2419_v8 }
 0x754   :  { %v694_v50 = vmax.f32 %v689_v48, 0.0 }
 0x756   :  { %2040 = vmatmul.mubr.f32.gmra.mrb[22].mxu0 %v694_v50 }
 0x757   :  { %2093 = vmatprep.mubr.msk.f32.mxu0 %vm2418_vm3, %v2419_v8 }
 0x821   :  { %v781_v57 = vpop.f32.mrb[18].mxu0 }
 0x822   :  { %v782_v58 = vadd.f32 %v781_v57, %v714_v56  ;;  %v2035_v59 = vpop.f32.mrb[19].mxu0 }
 0x824   :  { %v2747_v60 = vadd.f32 %v782_v58, %v592_v19 }
 0x825   :  { %v786_v61 = vpop.f32.mrb[20].mxu0 }
 0x826   :  { %v787_v62 = vadd.f32 %v786_v61, %v714_v56  ;;  %v2038_v63 = vpop.f32.mrb[21].mxu0  ;;  %2051 = vmatmul.mubr.msk.f32.vlgmr.msra.gmra.mrb[18].mxu1 %vm170_vm8, %v2747_v60 }
 0x827   :  { %2053 = vmatprep.mubr.msk.f32.mxu1 %vm2418_vm3, %v2419_v8 }
 0x828   :  { %v2753_v0 = vadd.f32 %v787_v62, %v593_v23 }
 0x829   :  { %v791_v1 = vpop.f32.mrb[22].mxu0 }
 0x82a   :  { %v792_v2 = vadd.f32 %v791_v1, %v714_v56  ;;  %v2041_v3 = vpop.f32.mrb[23].mxu0  ;;  %2054 = vmatmul.mubr.msk.f32.gmra.mrb[20].mxu1 %vm170_vm8, %v2753_v0 }
 0x82b   :  { %2056 = vmatprep.mubr.msk.f32.mxu1 %vm2418_vm3, %v2419_v8 }
 0x82c   :  { %v2759_v37 = vadd.f32 %v792_v2, %v594_v25 }
 0x82e   :  { %2057 = vmatmul.mubr.msk.f32.gmra.mrb[22].mxu1 %vm170_vm8, %v2759_v37 }
 0x82f   :  { %2065 = vmatprep.mubr.msk.f32.mxu1 %vm2418_vm3, %v2419_v8 }
 0x8f9   :  { %v884_v5 = vpop.f32.mrb[18].mxu1 }
 0x8fa   :  { %v2052_v9 = vpop.f32.mrb[19].mxu1  ;;  %v885_v11 = vadd.f32 %v884_v5, %v808_v6 }
 0x8fd   :  { %v889_v10 = vpop.f32.mrb[20].mxu1 }
 0x8fe   :  { %v890_v12 = vadd.f32 %v889_v10, %v808_v6  ;;  %v2055_v15 = vpop.f32.mrb[21].mxu1 }
 0x900   :  { %v2321_v16 = vpack.i.bf16 %v890_v12, %v885_v11 }
 0x901   :  { %v894_v17 = vpop.f32.mrb[22].mxu1 }
 0x902   :  { %v895_v18 = vadd.f32 %v894_v17, %v808_v6  ;;  %2322 = vrot.lane.b32.xlu1 %v2321_v16, %s2420_s21  ;;  %v2058_v19 = vpop.f32.mrb[23].mxu1 }
 0x904   :  { %905 = vrot.lane.b32.xlu0 %v895_v18, %s2420_s21 }
 0x974   :  { %v2323_v20 = vpop.permute.xlu1 %2322 }
 0x975   :  { %v2325_v21 = vunpack.i.h.bf16 %v2323_v20  ;;  %v2324_v22 = vunpack.i.l.bf16 %v2323_v20 }
 0x976   :  { %v906_v36 = vpop.permute.xlu0 %905 }
 0x977   :  { %v2249_v23 = vpack.c.bf16 %v2325_v21, %v2324_v22  ;;  %v1759_v22 = vld [vmem:[%s3028_s5 + $0x30] sm:$0xff] }
 0x979   :  { %2251 = vmatpush3.bf16.xpose.msk.msra.mxu1 %vm2579_vm10, %v2249_v23  ;;  %v1760_v23 = vld [vmem:[%s3028_s5 + $0x38] sm:$0xff] }
 0x97a   :  { %2063 = vmatprep.subr.mxu1 %v2419_v8 }
 0x981   :  { %2064 = vmatpush3.xpose.msk.msra.mxu1 %vm269_vm9, %v906_v36  ;;  %v2262_v36 = vpack.c.bf16 %v1760_v23, %v1759_v22 }
 0x982   :  { %2252 = vmatprep.subr.bf16.mxu1 %v2417_v7 }
 0x984   :  { %2066 = vmatmul.mubr.msk.f32.vlgmr.msra.gmra.mrb[24].mxu1 %vm269_vm9, %v885_v11  ;;  %v1757_v11 = vld [vmem:[%s3028_s5 + $0x20] sm:$0xff] }
 0x985   :  { %2068 = vmatprep.mubr.msk.f32.mxu1 %vm2418_vm3, %v2419_v8 }
 0x988   :  { %2069 = vmatmul.mubr.msk.f32.gmra.mrb[26].mxu1 %vm269_vm9, %v890_v12  ;;  %v1758_v12 = vld [vmem:[%s3028_s5 + $0x28] sm:$0xff] }
 0x989   :  { %2071 = vmatprep.mubr.msk.f32.mxu1 %vm2418_vm3, %v2419_v8  ;;  %v2259_v15 = vpack.c.bf16 %v1758_v12, %v1757_v11 }
 0x98c   :  { %2072 = vmatmul.mubr.msk.f32.gmra.mrb[28].mxu1 %vm269_vm9, %v895_v18 }
 0x98d   :  { %2080 = vmatprep.mubr.msk.f32.mxu1 %vm2418_vm3, %v2419_v8 }
 0xa57   :  { %v985_v52 = vpop.f32.mrb[24].mxu1 }
 0xa58   :  { %v2067_v24 = vpop.f32.mrb[25].mxu1  ;;  %v999_v26 = vsel %vm362_vm11, %v985_v52, -inf }
 0xa59   :  { %1000 = vmax.xlane.f32.xlu1 %v999_v26  ;;  %v1765_v24 = vld [vmem:[%s3029_s6 + $0x88] sm:$0xff]  ;;  %v1766_v26 = vld [vmem:[%s3029_s6 + $0x90] sm:$0xff] }
 0xa5b   :  { %v990_v27 = vpop.f32.mrb[26].mxu1 }
 0xa5c   :  { %v2070_v25 = vpop.f32.mrb[27].mxu1  ;;  %v1002_v28 = vsel %vm362_vm11, %v990_v27, -inf }
 0xa5d   :  { %1003 = vmax.xlane.f32.xlu0 %v1002_v28  ;;  %v1767_v25 = vld [vmem:[%s3029_s6 + $0x98] sm:$0xff] }
 0xa5e   :  { %v2268_v28 = vpack.c.bf16 %v1767_v25, %v1766_v26  ;;  %v1536_v25 = vld [vmem:[%s3031_s8 + $0x10] sm:$0xff] }
 0xa5f   :  { %v995_v29 = vpop.f32.mrb[28].mxu1 }
 0xa60   :  { %v2073_v30 = vpop.f32.mrb[29].mxu1  ;;  %v1005_v33 = vsel %vm369_vm12, %v995_v29, -inf }
 0xa61   :  { %1006 = vmax.xlane.f32.xlu0 %v1005_v33  ;;  %v1769_v30 = vld [vmem:[%s3029_s6 + $0xa8] sm:$0xff] }
 0xae6   :  { %v1001_v31 = vpop.xlane.xlu1 %1000 }
 0xae7   :  { %v1008_v32 = vsub.f32 %v985_v52, %v1001_v31  ;;  %v1764_v52 = vld [vmem:[%s3029_s6 + $0x80] sm:$0xff]  ;;  %v1770_v31 = vld [vmem:[%s3029_s6 + $0xb0] sm:$0xff] }
 0xae9   :  { %v1011_v38 = vmul.f32 1.442695, %v1008_v32  ;;  %v1771_v32 = vld [vmem:[%s3029_s6 + $0xb8] sm:$0xff] }
 0xaea   :  { %v1004_v39 = vpop.xlane.xlu0 %1003 }
 0xaeb   :  { %2343 = vpow2.f32 %v1011_v38  ;;  %v1009_v40 = vsub.f32 %v990_v27, %v1004_v39  ;;  %v2265_v27 = vpack.c.bf16 %v1765_v24, %v1764_v52  ;;  %v2274_v38 = vpack.c.bf16 %v1771_v32, %v1770_v31  ;;  %v1772_v39 = vld [vmem:[%s3029_s6 + $0xc0] sm:$0xff] }
 0xaed   :  { %v1013_v41 = vmul.f32 1.442695, %v1009_v40  ;;  %v1773_v40 = vld [vmem:[%s3029_s6 + $0xc8] sm:$0xff] }
 0xaee   :  { %v1007_v42 = vpop.xlane.xlu0 %1006 }
 0xaef   :  { %2345 = vpow2.f32 %v1013_v41  ;;  %v1010_v43 = vsub.f32 %v995_v29, %v1007_v42  ;;  %v1768_v29 = vld [vmem:[%s3029_s6 + $0xa0] sm:$0xff]  ;;  %v2277_v41 = vpack.c.bf16 %v1773_v40, %v1772_v39  ;;  %v1774_v42 = vld [vmem:[%s3029_s6 + $0xd0] sm:$0xff] }
 0xaf0   :  { %v2271_v33 = vpack.c.bf16 %v1769_v30, %v1768_v29  ;;  %v1351_v30 = vrot.slane %v2768_v4, %v713_v55 }
 0xaf1   :  { %v1015_v44 = vmul.f32 1.442695, %v1010_v43  ;;  %v1775_v43 = vld [vmem:[%s3029_s6 + $0xd8] sm:$0xff] }
 0xaf3   :  { %2347 = vpow2.f32 %v1015_v44  ;;  %v2280_v44 = vpack.c.bf16 %v1775_v43, %v1774_v42 }
 0xaf5   :  { %v2344_v45 = vpop.eup %2343 }
 0xaf6   :  { %v1017_v46 = vsel %vm362_vm11, %v2344_v45, 0.0 }
 0xaf7   :  { %1018 = vadd.xlane.f32.xlu1 %v1017_v46  ;;  %v1777_v46 = vld [vmem:[%s3029_s6 + $0xe8] sm:$0xff] }
 0xaf9   :  { %v2346_v47 = vpop.eup %2345 }
 0xafa   :  { %v1020_v48 = vsel %vm362_vm11, %v2346_v47, 0.0 }
 0xafb   :  { %1021 = vadd.xlane.f32.xlu0 %v1020_v48  ;;  %v1437_v48 = vadd.s32 8, %v2564_v35 }
 0xafd   :  { %v2348_v49 = vpop.eup %2347  ;;  %vm1440_vm15 = vcmp.eq.s32.totalorder %v1437_v48, %v2516_v13 }
 0xafe   :  { %v1023_v50 = vsel %vm369_vm12, %v2348_v49, 0.0  ;;  %vm2289_vm0 = vmpackc.low %vm1440_vm15, %vm1439_vm14 }
 0xaff   :  { %1024 = vadd.xlane.f32.xlu1 %v1023_v50 }
 0xb10   :  { %1036 = vrot.lane.b32.xlu1 %v895_v18, %s2421_s22 }
 0xb11   :  { %2327 = vrot.lane.b32.xlu0 %v2321_v16, %s2421_s22 }
 0xb84   :  { %v1019_v56 = vpop.xlane.xlu1 %1018 }
 0xb85   :  { %2349 = vrcp.f32 %v1019_v56 }
 0xb88   :  { %v1022_v57 = vpop.xlane.xlu0 %1021 }
 0xb89   :  { %2351 = vrcp.f32 %v1022_v57 }
 0xb8c   :  { %v1025_v58 = vpop.xlane.xlu1 %1024  ;;  %v2328_v59 = vpop.permute.xlu0 %2327 }
 0xb8d   :  { %v2330_v61 = vunpack.i.h.bf16 %v2328_v59  ;;  %v2329_v62 = vunpack.i.l.bf16 %v2328_v59  ;;  %2353 = vrcp.f32 %v1025_v58 }
 0xb8f   :  { %v2253_v63 = vpack.c.bf16 %v2330_v61, %v2329_v62  ;;  %v2350_v1 = vpop.eup %2349 }
 0xb90   :  { %v2805_v2 = vmul.f32 %v2350_v1, %v2344_v45  ;;  %v1037_v3 = vpop.permute.xlu1 %1036  ;;  %v1776_v45 = vld [vmem:[%s3029_s6 + $0xe0] sm:$0xff] }
 0xb91   :  { %2254 = vmatpush3.bf16.msra.mxu1 %v2253_v63 }
 0xb92   :  { %2078 = vmatprep.subr.mxu1 %v2419_v8 }
 0xb93   :  { %v2352_v5 = vpop.eup %2351 }
 0xb94   :  { %v2813_v6 = vmul.f32 %v2352_v5, %v2346_v47  ;;  %v2283_v47 = vpack.c.bf16 %v1777_v46, %v1776_v45  ;;  %v1534_v5 = vld [vmem:[%s3031_s8] sm:$0xff] }
 0xb95   :  { %2079 = vmatpush3.msk.msra.mxu1 %vm414_vm13, %v1037_v3 }
 0xb96   :  { %2081 = vmatmul.mubr.msk.f32.vlgmr.msra.gmra.mrb[30].mxu1 %vm362_vm11, %v2805_v2  ;;  %2258 = vmatprep.subr.bf16.mxu1 %v2417_v7 }
 0xb97   :  { %2083 = vmatprep.mubr.msk.f32.mxu1 %vm2418_vm3, %v2419_v8  ;;  %v2354_v9 = vpop.eup %2353  ;;  %2260 = vmatpush3.bf16.msra.mxu1 %v2259_v15 }
 0xb98   :  { %v2819_v10 = vmul.f32 %v2354_v9, %v2348_v49  ;;  %2261 = vmatprep.subr.bf16.mxu1 %v2417_v7  ;;  %v1137_v49 = vrot.slane %v2768_v4, %v501_v14  ;;  %v2422_v14 = vmov 1.0|1.0  }
 0xb9a   :  { %2084 = vmatmul.mubr.msk.f32.gmra.mrb[32].mxu1 %vm362_vm11, %v2813_v6 }
 0xb9b   :  { %2086 = vmatprep.mubr.msk.f32.mxu1 %vm2418_vm3, %v2419_v8  ;;  %2263 = vmatpush3.bf16.msra.mxu1 %v2262_v36 }
 0xb9c   :  { %2288 = vmatprep.subr.bf16.mxu1 %v2417_v7 }
 0xb9e   :  { %2087 = vmatmul.mubr.msk.f32.gmra.mrb[34].mxu1 %vm362_vm11, %v2819_v10 }
 0xb9f   :  { %2110 = vmatprep.mubr.msk.f32.mxu1 %vm2418_vm3, %v2419_v8 }
 0xc69   :  { %v1117_v16 = vpop.f32.mrb[30].mxu1 }
 0xc6a   :  { %v2082_v17 = vpop.f32.mrb[31].mxu1  ;;  %2094 = vmatmul.mubr.msk.f32.vlgmr.msra.gmra.mrb[24].mxu0 %vm269_vm9, %v1117_v16 }
 0xc6b   :  { %2096 = vmatprep.mubr.msk.f32.mxu0 %vm2418_vm3, %v2419_v8  ;;  %2266 = vmatpush3.bf16.msra.mxu0 %v2265_v27 }
 0xc6c   :  { %2267 = vmatprep.subr.bf16.mxu0 %v2417_v7 }
 0xc6d   :  { %v1122_v18 = vpop.f32.mrb[32].mxu1 }
 0xc6e   :  { %v2085_v19 = vpop.f32.mrb[33].mxu1  ;;  %2097 = vmatmul.mubr.msk.f32.gmra.mrb[26].mxu0 %vm269_vm9, %v1122_v18 }
 0xc6f   :  { %2099 = vmatprep.mubr.msk.f32.mxu0 %vm2418_vm3, %v2419_v8  ;;  %2269 = vmatpush3.bf16.msra.mxu0 %v2268_v28  ;;  %v1537_v28 = vld [vmem:[%s3031_s8 + $0x18] sm:$0xff] }
 0xc70   :  { %2270 = vmatprep.subr.bf16.mxu0 %v2417_v7  ;;  %v2295_v29 = vpack.c.bf16 %v1537_v28, %v1536_v25 }
 0xc71   :  { %v1127_v20 = vpop.f32.mrb[34].mxu1 }
 0xc72   :  { %v2088_v21 = vpop.f32.mrb[35].mxu1  ;;  %2100 = vmatmul.mubr.msk.f32.gmra.mrb[28].mxu0 %vm269_vm9, %v1127_v20 }
 0xc73   :  { %2151 = vmatprep.mubr.msk.f32.mxu0 %vm2418_vm3, %v2419_v8  ;;  %2272 = vmatpush3.bf16.msra.mxu0 %v2271_v33 }
 0xc74   :  { %2273 = vmatprep.subr.bf16.mxu0 %v2417_v7 }
 0xc77   :  { %2275 = vmatpush3.bf16.msra.mxu0 %v2274_v38 }
 0xc78   :  { %2276 = vmatprep.subr.bf16.mxu0 %v2417_v7 }
 0xc7b   :  { %2278 = vmatpush3.bf16.msra.mxu0 %v2277_v41 }
 0xc7c   :  { %2279 = vmatprep.subr.bf16.mxu0 %v2417_v7 }
 0xc7f   :  { %2281 = vmatpush3.bf16.msra.mxu0 %v2280_v44 }
 0xc80   :  { %2282 = vmatprep.subr.bf16.mxu0 %v2417_v7 }
 0xc83   :  { %2284 = vmatpush3.bf16.msra.mxu0 %v2283_v47 }
 0xc84   :  { %2285 = vmatprep.subr.bf16.mxu0 %v2417_v7 }
 0xd3d   :  { %v1213_v50 = vpop.f32.mrb[24].mxu0 }
 0xd3e   :  { %v1214_v53 = vadd.f32 %v1213_v50, %v1137_v49  ;;  %v2095_v54 = vpop.f32.mrb[25].mxu0 }
 0xd40   :  { %v2906_v56 = vadd.f32 %v1214_v53, %v2747_v60  ;;  %v1782_v60 = vsel %vm1441_vm1, 1.0, %v2419_v8 }
 0xd41   :  { %v1218_v57 = vpop.f32.mrb[26].mxu0 }
 0xd42   :  { %v1219_v58 = vadd.f32 %v1218_v57, %v1137_v49  ;;  %v2098_v59 = vpop.f32.mrb[27].mxu0  ;;  %2111 = vmatmul.mubr.msk.f32.vlgmr.msra.gmra.mrb[36].mxu1 %vm170_vm8, %v2906_v56 }
 0xd43   :  { %2113 = vmatprep.mubr.msk.f32.mxu1 %vm2418_vm3, %v2419_v8  ;;  %2290 = vmatpush3.bf16.msk.msra.mxu1 %vm2289_vm0, %v2422_v14 }
 0xd44   :  { %v2914_v61 = vadd.f32 %v1219_v58, %v2753_v0  ;;  %2164 = vmatprep.subr.mxu1 %v2419_v8  ;;  %v1778_v0 = vld [vmem:[%s3029_s6 + $0xf0] sm:$0xff] }
 0xd45   :  { %v1223_v62 = vpop.f32.mrb[28].mxu0 }
 0xd46   :  { %v1224_v63 = vadd.f32 %v1223_v62, %v1137_v49  ;;  %v2101_v1 = vpop.f32.mrb[29].mxu0  ;;  %2114 = vmatmul.mubr.msk.f32.gmra.mrb[38].mxu1 %vm170_vm8, %v2914_v61 }
 0xd47   :  { %2116 = vmatprep.mubr.msk.f32.mxu1 %vm2418_vm3, %v2419_v8  ;;  %2165 = vmatpush3.msk.msra.mxu1 %vm414_vm13, %v1782_v60 }
 0xd48   :  { %v2924_v3 = vadd.f32 %v1224_v63, %v2759_v37  ;;  %2291 = vmatprep.subr.bf16.mxu1 %v2417_v7  ;;  %v1779_v37 = vld [vmem:[%s3029_s6 + $0xf8] sm:$0xff] }
 0xd4a   :  { %2117 = vmatmul.mubr.msk.f32.gmra.mrb[40].mxu1 %vm170_vm8, %v2924_v3 }
 0xd4b   :  { %2166 = vmatprep.mubr.msk.f32.mxu1 %vm2418_vm3, %v2419_v8 }
 0xd4e   :  { %2167 = vmatmul.mubr.msk.f32.vlgmr.msra.gmra.mrb[42].mxu1 %vm362_vm11, %v2805_v2  ;;  %v2286_v2 = vpack.c.bf16 %v1779_v37, %v1778_v0 }
 0xd4f   :  { %2169 = vmatprep.mubr.msk.f32.mxu1 %vm2418_vm3, %v2419_v8 }
 0xd50   :  { %2287 = vmatpush3.bf16.msra.mxu0 %v2286_v2 }
 0xd52   :  { %2170 = vmatmul.mubr.msk.f32.gmra.mrb[44].mxu1 %vm362_vm11, %v2813_v6  ;;  %v1535_v6 = vld [vmem:[%s3031_s8 + $0x8] sm:$0xff] }
 0xd53   :  { %2172 = vmatprep.mubr.msk.f32.mxu1 %vm2418_vm3, %v2419_v8  ;;  %v2292_v9 = vpack.c.bf16 %v1535_v6, %v1534_v5 }
 0xd55   :  { %2293 = vmatpush3.bf16.msra.mxu1 %v2292_v9 }
 0xd56   :  { %2173 = vmatmul.mubr.msk.f32.gmra.mrb[46].mxu1 %vm362_vm11, %v2819_v10  ;;  %2294 = vmatprep.subr.bf16.mxu1 %v2417_v7  ;;  %v1238_v10 = vrot.slane %v2768_v4, %v601_v34  ;;  %v1789_v4 = vld [vmem:[%s3032_s9] ss:$0 sm:$0xff]  ;;  %s2423_s9 = smov [#allocation4]  }
 0xd57   :  { %2183 = vmatprep.mubr.msk.f32.mxu1 %vm2418_vm3, %v2419_v8  ;;  %s1693_s7 = sshll.u32 %s2423_s9, 4  ;;  %s1694_s7 = int_to_ptr.vmem [resolvable:$true] %s1693_s7 }
 0xd58   :  { %s2367_s21 = scalar_lea.vmem %s1694_s7, 384  ;;  %p2372_p1 = scmp.lt.s32.totalorder %s1694_s7, %s1694_s7 }
 0xd59   :  { %2296 = vmatpush3.bf16.msra.mxu1 %v2295_v29  ;;  %p2368_p0 = scmp.ne.s32.totalorder %s1694_s7, %s2367_s21  ;;  %p2373_p2 = scmp.lt.s32.totalorder %s2367_s21, %s2367_s21 }
 0xd5b   :  { %p2374_p3 = por %p2373_p2, %p2372_p1 }
 0xd5d   :  { %p2375_p4 = pnand %p2374_p3, %p2368_p0 }
 0xe15   :  { %v1314_v11 = vpop.f32.mrb[36].mxu1 }
 0xe16   :  { %v1315_v12 = vadd.f32 %v1314_v11, %v1238_v10  ;;  %v2112_v15 = vpop.f32.mrb[37].mxu1 }
 0xe18   :  { %v1328_v16 = vmax.f32 %v1315_v12, 0.0 }
 0xe19   :  { %v1319_v17 = vpop.f32.mrb[38].mxu1 }
 0xe1a   :  { %v1320_v18 = vadd.f32 %v1319_v17, %v1238_v10  ;;  %v2115_v19 = vpop.f32.mrb[39].mxu1  ;;  %2152 = vmatmul.mubr.f32.vlgmr.msra.gmra.mrb[30].mxu0 %v1328_v16 }
 0xe1b   :  { %2154 = vmatprep.mubr.msk.f32.mxu0 %vm2418_vm3, %v2419_v8 }
 0xe1c   :  { %v1329_v20 = vmax.f32 %v1320_v18, 0.0 }
 0xe1d   :  { %v1324_v21 = vpop.f32.mrb[40].mxu1 }
 0xe1e   :  { %v1325_v22 = vadd.f32 %v1324_v21, %v1238_v10  ;;  %v2118_v23 = vpop.f32.mrb[41].mxu1  ;;  %2155 = vmatmul.mubr.f32.gmra.mrb[32].mxu0 %v1329_v20 }
 0xe1f   :  { %2157 = vmatprep.mubr.msk.f32.mxu0 %vm2418_vm3, %v2419_v8 }
 0xe20   :  { %v1330_v7 = vmax.f32 %v1325_v22, 0.0 }
 0xe21   :  { %v1517_v34 = vpop.f32.mrb[42].mxu1 }
 0xe22   :  { %1531 = vst [vmem:[#allocation4] sm:$0xff] %v1517_v34  ;;  %2158 = vmatmul.mubr.f32.gmra.mrb[34].mxu0 %v1330_v7  ;;  %v2168_v36 = vpop.f32.mrb[43].mxu1 }
 0xe25   :  { %v1522_v52 = vpop.f32.mrb[44].mxu1 }
 0xe26   :  { %1532 = vst [vmem:[#allocation4 + $0x8] sm:$0xff] %v1522_v52  ;;  %v2171_v24 = vpop.f32.mrb[45].mxu1 }
 0xe29   :  { %v1527_v26 = vpop.f32.mrb[46].mxu1 }
 0xe2a   :  { %1533 = vst [vmem:[#allocation4 + $0x10] sm:$0xf] %v1527_v26  ;;  %v2174_v27 = vpop.f32.mrb[47].mxu1 }
 0xeed   :  { %v1418_v33 = vpop.f32.mrb[30].mxu0 }
 0xeee   :  { %v1419_v31 = vadd.f32 %v1418_v33, %v1351_v30  ;;  %v2153_v32 = vpop.f32.mrb[31].mxu0 }
 0xef0   :  { %v1432_v38 = vadd.f32 %v1419_v31, %v2906_v56 }
 0xef1   :  { %v1423_v39 = vpop.f32.mrb[32].mxu0 }
 0xef2   :  { %v1424_v40 = vadd.f32 %v1423_v39, %v1351_v30  ;;  %v2156_v41 = vpop.f32.mrb[33].mxu0  ;;  %2184 = vmatmul.mubr.msk.f32.vlgmr.msra.gmra.mrb[48].mxu1 %vm170_vm8, %v1432_v38 }
 0xef3   :  { %2186 = vmatprep.mubr.msk.f32.mxu1 %vm2418_vm3, %v2419_v8 }
 0xef4   :  { %v1433_v42 = vadd.f32 %v1424_v40, %v2914_v61 }
 0xef5   :  { %v1428_v43 = vpop.f32.mrb[34].mxu0 }
 0xef6   :  { %v1429_v44 = vadd.f32 %v1428_v43, %v1351_v30  ;;  %v2159_v35 = vpop.f32.mrb[35].mxu0  ;;  %2187 = vmatmul.mubr.msk.f32.gmra.mrb[50].mxu1 %vm170_vm8, %v1433_v42 }
 0xef7   :  { %2189 = vmatprep.mubr.msk.f32.mxu1 %vm2418_vm3, %v2419_v8 }
 0xef8   :  { %v1434_v55 = vadd.f32 %v1429_v44, %v2924_v3 }
 0xefa   :  { %2190 = vmatmul.mubr.msk.f32.gmra.mrb[52].mxu1 %vm170_vm8, %v1434_v55 }
 0xfc5   :  { %v1620_v45 = vpop.f32.mrb[48].mxu1 }
 0xfc6   :  { %v1621_v46 = vadd.f32 %v1789_v4, %v1620_v45  ;;  %v2185_v47 = vpop.f32.mrb[49].mxu1 }
 0xfc8   :  { %v1635_v48 = vsel %vm1634_vm2, %v1621_v46, -1e+30 }
 0xfc9   :  { %1638 = vmax.xlane.f32.xlu0 %v1635_v48  ;;  %v1625_v49 = vpop.f32.mrb[50].mxu1 }
 0xfca   :  { %v1626_v50 = vadd.f32 %v1789_v4, %v1625_v49  ;;  %v2188_v51 = vpop.f32.mrb[51].mxu1 }
 0xfcc   :  { %v1636_v53 = vsel %vm1634_vm2, %v1626_v50, -1e+30 }
 0xfcd   :  { %1640 = vmax.xlane.f32.xlu0 %v1636_v53  ;;  %v1630_v8 = vpop.f32.mrb[52].mxu1 }
 0xfce   :  { %v1631_v54 = vadd.f32 %v1789_v4, %v1630_v8  ;;  %v2191_v56 = vpop.f32.mrb[53].mxu1 }
 0xfd0   :  { %v2986_v57 = vsel %vm1634_vm2, %v1631_v54, -1e+30 }
 0xfd1   :  { %v1642_v58 = vsel %vm414_vm13, %v2986_v57, -inf }
 0xfd2   :  { %1643 = vmax.xlane.f32.xlu1 %v1642_v58 }
0x1056   :  { %v1639_v59 = vpop.xlane.xlu0 %1638 }
0x1057   :  { %v1645_v13 = vsub.f32 %v1635_v48, %v1639_v59 }
0x1059   :  { %v1648_v14 = vmul.f32 1.442695, %v1645_v13 }
0x105a   :  { %v1641_v61 = vpop.xlane.xlu0 %1640 }
0x105b   :  { %2355 = vpow2.f32 %v1648_v14  ;;  %v1646_v60 = vsub.f32 %v1636_v53, %v1641_v61 }
0x105d   :  { %v1650_v62 = vmul.f32 1.442695, %v1646_v60 }
0x105f   :  { %2357 = vpow2.f32 %v1650_v62  ;;  %v1644_v63 = vpop.xlane.xlu1 %1643 }
0x1060   :  { %v1647_v1 = vsub.f32 %v2986_v57, %v1644_v63 }
0x1062   :  { %v1652_v3 = vmul.f32 1.442695, %v1647_v1 }
0x1064   :  { %2359 = vpow2.f32 %v1652_v3 }
0x1065   :  { %v2356_v0 = vpop.eup %2355 }
0x1066   :  { %1654 = vadd.xlane.f32.xlu1 %v2356_v0 }
0x1069   :  { %v2358_v37 = vpop.eup %2357 }
0x106a   :  { %1656 = vadd.xlane.f32.xlu0 %v2358_v37 }
0x106e   :  { %v2360_v2 = vpop.eup %2359 }
0x106f   :  { %v1658_v5 = vsel %vm414_vm13, %v2360_v2, 0.0 }
0x1070   :  { %1659 = vadd.xlane.f32.xlu1 %v1658_v5 }
0x1071   :  { %2378 = shalt.err (!%p2375_p4)
}
0x1072   :  { %s2379_s4 = scalar_lea.hbm %s3034_s11, 384 }
0x1073   :  { %p2380_p5 = scmp.ne.s32.totalorder %s3034_s11, %s2379_s4  ;;  %p2383_p6 = scmp.lt.u32.totalorder %s2379_s4, %s3034_s11 }
0x1075   :  { %p2385_p7 = pnand %p2383_p6, %p2380_p5 }
0x1077   :  { %2388 = shalt.err (!%p2385_p7)
}
0x1078   :  { %s2424_s2 = smov 128   ;;  %s2425_s20 = smov 8  }
0x1079   :  { %1699 = dma.vmem_to_hbm [thread:$0]  %s1694_s7, 384, %s3034_s11, [#allocation5], %s2424_s2, %s2424_s2, %s2425_s20  }
0x107a   :  { %s2426_s25 = smov [#allocation2]  }
0x107b   :  { %s1681_s11 = sshll.u32 %s2426_s25, 4  ;;  %s1682_s11 = int_to_ptr.vmem [resolvable:$true] %s1681_s11 }
0x107c   :  { %s2389_s26 = scalar_lea.vmem %s1682_s11, 384  ;;  %p2394_p9 = scmp.lt.s32.totalorder %s1682_s11, %s1682_s11 }
0x107d   :  { %p2390_p8 = scmp.ne.s32.totalorder %s1682_s11, %s2389_s26  ;;  %p2395_p10 = scmp.lt.s32.totalorder %s2389_s26, %s2389_s26 }
0x107f   :  { %p2396_p11 = por %p2395_p10, %p2394_p9 }
0x1081   :  { %p2397_p12 = pnand %p2396_p11, %p2390_p8 }
0x10f3   :  { %v1655_v6 = vpop.xlane.xlu1 %1654 }
0x10f4   :  { %2361 = vlog2.f32 %v1655_v6 }
0x10f7   :  { %v1657_v9 = vpop.xlane.xlu0 %1656 }
0x10f8   :  { %2363 = vlog2.f32 %v1657_v9 }
0x10fd   :  { %v1660_v10 = vpop.xlane.xlu1 %1659 }
0x10fe   :  { %v2362_v11 = vpop.eup %2361  ;;  %2365 = vlog2.f32 %v1660_v10 }
0x10ff   :  { %v1662_v12 = vmul.f32 0.6931472, %v2362_v11 }
0x1101   :  { %v1667_v15 = vadd.f32 %v1662_v12, %v1639_v59 }
0x1102   :  { %v2364_v16 = vpop.eup %2363 }
0x1103   :  { %v1670_v17 = vsub.f32 %v1635_v48, %v1667_v15  ;;  %v1664_v18 = vmul.f32 0.6931472, %v2364_v16 }
0x1105   :  { %1673 = vst [vmem:[#allocation2] sm:$0xff] %v1670_v17  ;;  %v1668_v19 = vadd.f32 %v1664_v18, %v1641_v61 }
0x1107   :  { %v1671_v20 = vsub.f32 %v1636_v53, %v1668_v19 }
0x1108   :  { %v2366_v21 = vpop.eup %2365 }
0x1109   :  { %1674 = vst [vmem:[#allocation2 + $0x8] sm:$0xff] %v1671_v20  ;;  %v1666_v22 = vmul.f32 0.6931472, %v2366_v21 }
0x110b   :  { %v1669_v23 = vadd.f32 %v1666_v22, %v1644_v63 }
0x110d   :  { %v1672_v7 = vsub.f32 %v2986_v57, %v1669_v23 }
0x110f   :  { %1675 = vst [vmem:[#allocation2 + $0x10] sm:$0xf] %v1672_v7 }
0x1110   :  { %2400 = shalt.err (!%p2397_p12)
}
0x1111   :  { %s2401_s27 = scalar_lea.hbm %s3033_s10, 384 }
0x1112   :  { %p2402_p13 = scmp.ne.s32.totalorder %s3033_s10, %s2401_s27  ;;  %p2405_p0 = scmp.lt.u32.totalorder %s2401_s27, %s3033_s10 }
0x1114   :  { %p2407_p1 = pnand %p2405_p0, %p2402_p13 }
0x1116   :  { %2410 = shalt.err (!%p2407_p1)
}
0x1117   :  { %1687 = dma.vmem_to_hbm [thread:$0]  %s1682_s11, 384, %s3033_s10, [#allocation3], %s2424_s2, %s2424_s2, %s2425_s20  }
0x1118   :  { %2411 = dma.done.wait [#allocation3], 384  }
0x1119   :  { %2412 = vsyncadd [#allocation3], 4294966912 }
0x111a   :  { %2413 = dma.done.wait [#allocation5], 384  }
0x111b   :  { %2414 = vsyncadd [#allocation5], 4294966912 }
0x111c   :  { %1706 = vsyncpa [#allocation3], 1 }
0x111d   :  { %1707 = vsyncpa [#allocation5], 1 }

</bundles_post_ra>
